<compile_context>
chip_gen: v5e
topology: v5e:2x2
jax: 0.10.0
libtpu: 0.0.40
codegen_flags: <defaults>
</compile_context>

<pallas_src>
import functools

import jax
import jax.numpy as jnp
from jax.experimental import pallas as pl
from jax.experimental.pallas import tpu as pltpu


def _round_up(x: int, m: int) -> int:
    return (x + m - 1) // m * m


def _mlp_kernel(x_ref, w1_ref, b1_ref, w2_ref, b2_ref, w3_ref, b3_ref, o_ref):
    # x: (TM, in_p) bf16; w*: (in, out)-layout bf16; b*: (1, dim) f32; o: (TM, out_p) f32.
    x = x_ref[...]
    h1 = jnp.dot(x, w1_ref[...], preferred_element_type=jnp.float32) + b1_ref[...]
    h1 = jnp.maximum(h1, 0.0).astype(jnp.bfloat16)
    h2 = jnp.dot(h1, w2_ref[...], preferred_element_type=jnp.float32) + b2_ref[...]
    h2 = jnp.maximum(h2, 0.0).astype(jnp.bfloat16)
    y = jnp.dot(h2, w3_ref[...], preferred_element_type=jnp.float32) + b3_ref[...]
    o_ref[...] = y.astype(o_ref.dtype)


def _vmem_budget_bytes(tm, in_p, hid_p, out_p):
    # Resident weights (assume 2 buffers each), bf16.
    w = 2 * 2 * (in_p * hid_p + hid_p * hid_p + hid_p * out_p)
    b = 2 * 4 * (hid_p + hid_p + out_p)
    # Double-buffered input / output tiles.
    x = 2 * 2 * tm * in_p
    o = 2 * 4 * tm * out_p
    # In-flight intermediates (h1/h2 in f32 + bf16 copies), generous.
    act = 4 * tm * (3 * hid_p + out_p)
    total = int((w + b + x + o + act) * 2) + (8 << 20)  # 2x slack + internal scratch
    return max(16 << 20, min(total, 48 << 20))          # stay well inside v7x's 64 MiB


def init_params(key, in_size, out_size, hid_size):
    """Deterministic synthetic init, PyTorch weight convention (out, in), f32."""
    ks = jax.random.split(key, 6)

    def lin(kw, kb, fan_in, fan_out):
        bound = 1.0 / jnp.sqrt(fan_in)
        w = jax.random.uniform(kw, (fan_out, fan_in), jnp.float32, -bound, bound)
        b = jax.random.uniform(kb, (fan_out,), jnp.float32, -bound, bound)
        return w, b

    w1, b1 = lin(ks[0], ks[1], in_size, hid_size)
    w2, b2 = lin(ks[2], ks[3], hid_size, hid_size)
    w3, b3 = lin(ks[4], ks[5], hid_size, out_size)
    return {"w1": w1, "b1": b1, "w2": w2, "b2": b2, "w3": w3, "b3": b3}


def prepare_params(params, in_size, hid_size, out_size):
    """One-time prep: transpose (out,in)->(in,out), zero-pad feature dims to
    multiples of 128 (lane alignment), cast weights to bf16, biases stay f32."""
    in_p = _round_up(in_size, 128)
    hid_p = _round_up(hid_size, 128)
    out_p = _round_up(out_size, 128)

    def pad2(w, rows, cols):
        return jnp.pad(w, ((0, rows - w.shape[0]), (0, cols - w.shape[1])))

    def pad_bias(b, n):
        return jnp.pad(b, (0, n - b.shape[0])).reshape(1, n).astype(jnp.float32)

    return {
        "w1t": pad2(params["w1"].T, in_p, hid_p).astype(jnp.bfloat16),
        "w2t": pad2(params["w2"].T, hid_p, hid_p).astype(jnp.bfloat16),
        "w3t": pad2(params["w3"].T, hid_p, out_p).astype(jnp.bfloat16),
        "b1": pad_bias(params["b1"], hid_p),
        "b2": pad_bias(params["b2"], hid_p),
        "b3": pad_bias(params["b3"], out_p),
        "in_size": in_size,
        "out_size": out_size,
        "in_p": in_p,
        "hid_p": hid_p,
        "out_p": out_p,
    }


def simple_nn_forward(X, prep):
    """Replicates SimpleNN.forward.

    X: (N, A, B) -> reshaped to (N, A*B); any other rank -> flattened to a single
    row (PyTorch's unbatched Linear path, result squeezed back to a vector).
    """
    squeeze_out = False
    if X.ndim == 3:
        x2d = X.reshape(X.shape[0], -1)
    else:
        x2d = X.reshape(1, -1)
        squeeze_out = True

    N, in_size = x2d.shape
    assert in_size == prep["in_size"], "input feature size mismatch with prepared params"
    in_p, hid_p, out_p = prep["in_p"], prep["hid_p"], prep["out_p"]
    out_size = prep["out_size"]

    # Batch tile: multiple of 8 sublanes, up to 256 rows per grid step.
    TM = min(256, _round_up(N, 8))
    num_tiles = pl.cdiv(N, TM)
    n_pad = num_tiles * TM

    x_pad = jnp.zeros((n_pad, in_p), jnp.bfloat16)
    x_pad = x_pad.at[:N, :in_size].set(x2d.astype(jnp.bfloat16))

    vmem_budget = _vmem_budget_bytes(TM, in_p, hid_p, out_p)

    y_pad = pl.pallas_call(
        _mlp_kernel,
        out_shape=jax.ShapeDtypeStruct((n_pad, out_p), jnp.float32),
        grid=(num_tiles,),
        in_specs=[
            pl.BlockSpec((TM, in_p), lambda i: (i, 0)),        # X tile, pipelined
            pl.BlockSpec((in_p, hid_p), lambda i: (0, 0)),     # W1 resident
            pl.BlockSpec((1, hid_p), lambda i: (0, 0)),        # b1 resident
            pl.BlockSpec((hid_p, hid_p), lambda i: (0, 0)),    # W2 resident
            pl.BlockSpec((1, hid_p), lambda i: (0, 0)),        # b2 resident
            pl.BlockSpec((hid_p, out_p), lambda i: (0, 0)),    # W3 resident
            pl.BlockSpec((1, out_p), lambda i: (0, 0)),        # b3 resident
        ],
        out_specs=pl.BlockSpec((TM, out_p), lambda i: (i, 0)),
        compiler_params=pltpu.CompilerParams(
            dimension_semantics=("parallel",),
            vmem_limit_bytes=vmem_budget,
        ),
    )(x_pad, prep["w1t"], prep["b1"], prep["w2t"], prep["b2"], prep["w3t"], prep["b3"])

    y = y_pad[:N, :out_size]
    if squeeze_out:
        y = y.reshape(out_size)
    return y


if __name__ == "__main__":
    key = jax.random.PRNGKey(0)
    k_x, k_p = jax.random.split(key)

    # Small shapes: batch N=2, input (N, 4, 8) -> in_size=32, hid=32, out=16.
    N, A, B = 2, 4, 8
    in_size = A * B
    hid_size = 32
    out_size = 16

    X = jax.random.normal(k_x, (N, A, B), dtype=jnp.float32)
    params = init_params(k_p, in_size, out_size, hid_size)
    prep = prepare_params(params, in_size, hid_size, out_size)

    fwd = jax.jit(functools.partial(simple_nn_forward, prep=prep))
    y = jax.block_until_ready(fwd(X))

    # Pure-JAX f32 reference (same math as the PyTorch module).
    x2d = X.reshape(N, -1)
    h = jnp.maximum(x2d @ params["w1"].T + params["b1"], 0.0)
    h = jnp.maximum(h @ params["w2"].T + params["b2"], 0.0)
    ref = h @ params["w3"].T + params["b3"]

    assert y.shape == (N, out_size)
    # bf16 matmul operands (f32 accumulation) => loosened tolerance vs f32 reference.
    assert jnp.allclose(y, ref, atol=5e-2, rtol=5e-2), (
        f"max abs err {jnp.max(jnp.abs(y - ref))}")

    print("KERNEL_OK")
</pallas_src>

<mosaic_0001>
module attributes {stable_mosaic.version = 11 : i64} {
  func.func @_mlp_kernel(%arg0: i32, %arg1: memref<8x128xbf16, #tpu.memory_space<vmem>>, %arg2: memref<128x128xbf16, #tpu.memory_space<vmem>>, %arg3: memref<1x128xf32, #tpu.memory_space<vmem>>, %arg4: memref<128x128xbf16, #tpu.memory_space<vmem>>, %arg5: memref<1x128xf32, #tpu.memory_space<vmem>>, %arg6: memref<128x128xbf16, #tpu.memory_space<vmem>>, %arg7: memref<1x128xf32, #tpu.memory_space<vmem>>, %arg8: memref<8x128xf32, #tpu.memory_space<vmem>>) attributes {dimension_semantics = [#tpu.dimension_semantics<parallel>], iteration_bounds = array<i64: 1>, scalar_prefetch = 0 : i64, scratch_operands = 0 : i64, tpu.core_type = #tpu.core_type<tc>, window_params = [{transform_indices = @transform_0, window_bounds = array<i64: 8, 128>}, {pipeline_mode = #tpu.pipeline_mode<synchronous>, transform_indices = @transform_1, window_bounds = array<i64: 128, 128>}, {pipeline_mode = #tpu.pipeline_mode<synchronous>, transform_indices = @transform_2, window_bounds = array<i64: 1, 128>}, {pipeline_mode = #tpu.pipeline_mode<synchronous>, transform_indices = @transform_3, window_bounds = array<i64: 128, 128>}, {pipeline_mode = #tpu.pipeline_mode<synchronous>, transform_indices = @transform_4, window_bounds = array<i64: 1, 128>}, {pipeline_mode = #tpu.pipeline_mode<synchronous>, transform_indices = @transform_5, window_bounds = array<i64: 128, 128>}, {pipeline_mode = #tpu.pipeline_mode<synchronous>, transform_indices = @transform_6, window_bounds = array<i64: 1, 128>}, {transform_indices = @transform_7, window_bounds = array<i64: 8, 128>}]} {
    %c0 = arith.constant 0 : index
    %c0_0 = arith.constant 0 : index
    %0 = vector.load %arg1[%c0, %c0_0] : memref<8x128xbf16, #tpu.memory_space<vmem>>, vector<8x128xbf16>
    %c0_1 = arith.constant 0 : index
    %c0_2 = arith.constant 0 : index
    %1 = vector.load %arg2[%c0_1, %c0_2] : memref<128x128xbf16, #tpu.memory_space<vmem>>, vector<128x128xbf16>
    %cst = arith.constant dense<0.000000e+00> : vector<8x128xf32>
    %2 = tpu.matmul %0, %1, %cst {dimension_numbers = #tpu.dot_dimension_numbers<[1], [0], [0], [1], [0, 0, 1, 1], [], []>} : vector<8x128xbf16>, vector<128x128xbf16>, vector<8x128xf32> -> vector<8x128xf32>
    %c0_3 = arith.constant 0 : index
    %c0_4 = arith.constant 0 : index
    %3 = vector.load %arg3[%c0_3, %c0_4] : memref<1x128xf32, #tpu.memory_space<vmem>>, vector<1x128xf32>
    %4 = vector.broadcast %3 : vector<1x128xf32> to vector<8x128xf32>
    %5 = arith.addf %2, %4 : vector<8x128xf32>
    %cst_5 = arith.constant 0.000000e+00 : f32
    %6 = vector.broadcast %cst_5 : f32 to vector<8x128xf32>
    %7 = arith.maximumf %5, %6 : vector<8x128xf32>
    %8 = arith.truncf %7 : vector<8x128xf32> to vector<8x128xbf16>
    %c0_6 = arith.constant 0 : index
    %c0_7 = arith.constant 0 : index
    %9 = vector.load %arg4[%c0_6, %c0_7] : memref<128x128xbf16, #tpu.memory_space<vmem>>, vector<128x128xbf16>
    %cst_8 = arith.constant dense<0.000000e+00> : vector<8x128xf32>
    %10 = tpu.matmul %8, %9, %cst_8 {dimension_numbers = #tpu.dot_dimension_numbers<[1], [0], [0], [1], [0, 0, 1, 1], [], []>} : vector<8x128xbf16>, vector<128x128xbf16>, vector<8x128xf32> -> vector<8x128xf32>
    %c0_9 = arith.constant 0 : index
    %c0_10 = arith.constant 0 : index
    %11 = vector.load %arg5[%c0_9, %c0_10] : memref<1x128xf32, #tpu.memory_space<vmem>>, vector<1x128xf32>
    %12 = vector.broadcast %11 : vector<1x128xf32> to vector<8x128xf32>
    %13 = arith.addf %10, %12 : vector<8x128xf32>
    %cst_11 = arith.constant 0.000000e+00 : f32
    %14 = vector.broadcast %cst_11 : f32 to vector<8x128xf32>
    %15 = arith.maximumf %13, %14 : vector<8x128xf32>
    %16 = arith.truncf %15 : vector<8x128xf32> to vector<8x128xbf16>
    %c0_12 = arith.constant 0 : index
    %c0_13 = arith.constant 0 : index
    %17 = vector.load %arg6[%c0_12, %c0_13] : memref<128x128xbf16, #tpu.memory_space<vmem>>, vector<128x128xbf16>
    %cst_14 = arith.constant dense<0.000000e+00> : vector<8x128xf32>
    %18 = tpu.matmul %16, %17, %cst_14 {dimension_numbers = #tpu.dot_dimension_numbers<[1], [0], [0], [1], [0, 0, 1, 1], [], []>} : vector<8x128xbf16>, vector<128x128xbf16>, vector<8x128xf32> -> vector<8x128xf32>
    %c0_15 = arith.constant 0 : index
    %c0_16 = arith.constant 0 : index
    %19 = vector.load %arg7[%c0_15, %c0_16] : memref<1x128xf32, #tpu.memory_space<vmem>>, vector<1x128xf32>
    %20 = vector.broadcast %19 : vector<1x128xf32> to vector<8x128xf32>
    %21 = arith.addf %18, %20 : vector<8x128xf32>
    %c0_17 = arith.constant 0 : index
    %c0_18 = arith.constant 0 : index
    %22 = vector.load %arg8[%c0_17, %c0_18] : memref<8x128xf32, #tpu.memory_space<vmem>>, vector<8x128xf32>
    tpu.vector_store %arg8[%c0_17, %c0_18], %21 {strides = array<i32>} : memref<8x128xf32, #tpu.memory_space<vmem>>, vector<8x128xf32>,
    return
  }
  func.func @transform_0(%arg0: i32) -> (i32, i32) {
    %c0_i32 = arith.constant 0 : i32
    %c0_i32_0 = arith.constant 0 : i32
    return %arg0, %c0_i32 : i32, i32
  }
  func.func @transform_1(%arg0: i32) -> (i32, i32) {
    %c0_i32 = arith.constant 0 : i32
    %c0_i32_0 = arith.constant 0 : i32
    %c0_i32_1 = arith.constant 0 : i32
    return %c0_i32, %c0_i32_0 : i32, i32
  }
  func.func @transform_2(%arg0: i32) -> (i32, i32) {
    %c0_i32 = arith.constant 0 : i32
    %c0_i32_0 = arith.constant 0 : i32
    %c0_i32_1 = arith.constant 0 : i32
    return %c0_i32, %c0_i32_0 : i32, i32
  }
  func.func @transform_3(%arg0: i32) -> (i32, i32) {
    %c0_i32 = arith.constant 0 : i32
    %c0_i32_0 = arith.constant 0 : i32
    %c0_i32_1 = arith.constant 0 : i32
    return %c0_i32, %c0_i32_0 : i32, i32
  }
  func.func @transform_4(%arg0: i32) -> (i32, i32) {
    %c0_i32 = arith.constant 0 : i32
    %c0_i32_0 = arith.constant 0 : i32
    %c0_i32_1 = arith.constant 0 : i32
    return %c0_i32, %c0_i32_0 : i32, i32
  }
  func.func @transform_5(%arg0: i32) -> (i32, i32) {
    %c0_i32 = arith.constant 0 : i32
    %c0_i32_0 = arith.constant 0 : i32
    %c0_i32_1 = arith.constant 0 : i32
    return %c0_i32, %c0_i32_0 : i32, i32
  }
  func.func @transform_6(%arg0: i32) -> (i32, i32) {
    %c0_i32 = arith.constant 0 : i32
    %c0_i32_0 = arith.constant 0 : i32
    %c0_i32_1 = arith.constant 0 : i32
    return %c0_i32, %c0_i32_0 : i32, i32
  }
  func.func @transform_7(%arg0: i32) -> (i32, i32) {
    %c0_i32 = arith.constant 0 : i32
    %c0_i32_0 = arith.constant 0 : i32
    return %arg0, %c0_i32 : i32, i32
  }
}

</mosaic_0001>

<bundles_post_ra>
// kernel: simple_nn_forward.1
= control target key start
LH: loop header
LB: loop body
LE: loop exit
PB: predicated region body
PF: predicated region fallthrough
CT: control target
= control target key end

     0   :  { %12 = vsyncpa [#allocation3], 0  ;;  %s601_s0 = inlined_call_operand.vmem [shape: bf16[8,128], index: 0, kind: input, shape index: {}]   ;;  %s602_s1 = inlined_call_operand.hbm [shape: bf16[128,128], index: 1, kind: input, shape index: {}]   ;;  %s603_s2 = inlined_call_operand.vmem [shape: f32[1,128], index: 2, kind: input, shape index: {}]   ;;  %s604_s3 = inlined_call_operand.hbm [shape: bf16[128,128], index: 3, kind: input, shape index: {}]   ;;  %s605_s4 = inlined_call_operand.vmem [shape: f32[1,128], index: 4, kind: input, shape index: {}]   ;;  %s606_s5 = inlined_call_operand.hbm [shape: bf16[128,128], index: 5, kind: input, shape index: {}]   ;;  %s607_s6 = inlined_call_operand.vmem [shape: f32[1,128], index: 6, kind: input, shape index: {}]   ;;  %s608_s7 = inlined_call_operand.vmem [shape: f32[8,128], index: 7, kind: output, shape index: {}]  }
   0x1   :  { %13 = vsyncpa [#allocation5], 0  ;;  %s35_s26 = sshll.u32 %s604_s3, 4  ;;  %s532_s27 = smov [#allocation4]   ;;  %s36_s26 = int_to_ptr.hbm [resolvable:$true] %s35_s26 }
   0x2   :  { %s37_s28 = sshll.u32 %s532_s27, 4  ;;  %s20_s8 = sshll.u32 %s602_s1, 4  ;;  %s38_s28 = int_to_ptr.vmem [resolvable:$true] %s37_s28  ;;  %s21_s8 = int_to_ptr.hbm [resolvable:$true] %s20_s8 }
   0x3   :  { %s533_s9 = smov 64   ;;  %s534_s10 = smov 4  }
   0x4   :  { %43 = dma.hbm_to_vmem [thread:$0]  %s36_s26, 1024, %s38_s28, [#allocation5], %s533_s9, %s533_s9, %s534_s10  }
   0x5   :  { %s535_s11 = smov [#allocation2]   ;;  %s50_s15 = sshll.u32 %s606_s5, 4  ;;  %s51_s15 = int_to_ptr.hbm [resolvable:$true] %s50_s15 }
   0x6   :  { %s22_s12 = sshll.u32 %s535_s11, 4  ;;  %s536_s3 = smov [#allocation6]   ;;  %s23_s12 = int_to_ptr.vmem [resolvable:$true] %s22_s12 }
   0x7   :  { %28 = dma.hbm_to_vmem [thread:$0]  %s21_s8, 1024, %s23_s12, [#allocation3], %s533_s9, %s533_s9, %s534_s10  }
   0x8   :  { %s52_s16 = sshll.u32 %s536_s3, 4  ;;  %s53_s16 = int_to_ptr.vmem [resolvable:$true] %s52_s16 }
   0x9   :  { %58 = dma.hbm_to_vmem [thread:$0]  %s51_s15, 1024, %s53_s16, [#allocation5], %s533_s9, %s533_s9, %s534_s10  }
   0xa   :  { %528 = dma.done.wait [#allocation3], 1024  }
   0xb   :  { %529 = vsyncadd [#allocation3], 4294966272 }
   0xc   :  { %530 = dma.done.wait [#allocation5], 2048  }
   0xd   :  { %531 = vsyncadd [#allocation5], 4294965248  ;;  %v431_v0 = vld [vmem:[#allocation2 + $0x38] sm:$0xff]  ;;  %v430_v1 = vld [vmem:[#allocation2 + $0x30] sm:$0xff] }
   0xe   :  { %142 = vmatpush.bf16.msra.mxu0 %v431_v0  ;;  %v439_v2 = vld [vmem:[#allocation4 + $0x38] sm:$0xff]  ;;  %v438_v3 = vld [vmem:[#allocation4 + $0x30] sm:$0xff]  ;;  %v429_v4 = vld [vmem:[#allocation2 + $0x28] sm:$0xff] }
   0xf   :  { %225 = vmatpush.bf16.msra.mxu1 %v439_v2  ;;  %v437_v5 = vld [vmem:[#allocation4 + $0x28] sm:$0xff]  ;;  %v428_v6 = vld [vmem:[#allocation2 + $0x20] sm:$0xff]  ;;  %v427_v8 = vld [vmem:[#allocation2 + $0x18] sm:$0xff] }
  0x10   :  { %v436_v7 = vld [vmem:[#allocation4 + $0x20] sm:$0xff]  ;;  %v435_v9 = vld [vmem:[#allocation4 + $0x18] sm:$0xff]  ;;  %v426_v10 = vld [vmem:[#allocation2 + $0x10] sm:$0xff] }
  0x11   :  { %v434_v11 = vld [vmem:[#allocation4 + $0x10] sm:$0xff]  ;;  %v425_v12 = vld [vmem:[#allocation2 + $0x8] sm:$0xff]  ;;  %v424_v13 = vld [vmem:[#allocation2] sm:$0xff] }
  0x12   :  { %143 = vmatpush.bf16.msra.mxu0 %v430_v1  ;;  %v73_v14 = vld [vmem:[%s601_s0] sm:$0xf]  ;;  %v433_v15 = vld [vmem:[#allocation4 + $0x8] sm:$0xff]  ;;  %v447_v17 = vld [vmem:[#allocation6 + $0x38] sm:$0xff] }
  0x13   :  { %226 = vmatpush.bf16.msra.mxu1 %v438_v3  ;;  %v432_v16 = vld [vmem:[#allocation4] sm:$0xff]  ;;  %308 = vmatpush.bf16.msra.mxu2 %v447_v17  ;;  %v446_v18 = vld [vmem:[#allocation6 + $0x30] sm:$0xff]  ;;  %v445_v19 = vld [vmem:[#allocation6 + $0x28] sm:$0xff] }
  0x14   :  { %v444_v20 = vld [vmem:[#allocation6 + $0x20] sm:$0xff]  ;;  %v443_v21 = vld [vmem:[#allocation6 + $0x18] sm:$0xff]  ;;  %v442_v22 = vld [vmem:[#allocation6 + $0x10] sm:$0xff] }
  0x15   :  { %v453_v23 = vld [vmem:[%s603_s2] ss:$0 sm:$0xff]  ;;  %v441_v29 = vld [vmem:[#allocation6 + $0x8] sm:$0xff] }
  0x16   :  { %144 = vmatpush.bf16.msra.mxu0 %v429_v4  ;;  %v440_v30 = vld [vmem:[#allocation6] sm:$0xff] }
  0x17   :  { %227 = vmatpush.bf16.msra.mxu1 %v437_v5  ;;  %309 = vmatpush.bf16.msra.mxu2 %v446_v18  ;;  %v454_v31 = vld [vmem:[%s605_s4] ss:$0 sm:$0xff] }
  0x18   :  { %v455_v37 = vld [vmem:[%s607_s6] ss:$0 sm:$0xff] }
  0x1a   :  { %145 = vmatpush.bf16.msra.mxu0 %v428_v6 }
  0x1b   :  { %228 = vmatpush.bf16.msra.mxu1 %v436_v7  ;;  %310 = vmatpush.bf16.msra.mxu2 %v445_v19 }
  0x1e   :  { %146 = vmatpush.bf16.msra.mxu0 %v427_v8 }
  0x1f   :  { %229 = vmatpush.bf16.msra.mxu1 %v435_v9  ;;  %311 = vmatpush.bf16.msra.mxu2 %v444_v20 }
  0x22   :  { %147 = vmatpush.bf16.msra.mxu0 %v426_v10 }
  0x23   :  { %230 = vmatpush.bf16.msra.mxu1 %v434_v11  ;;  %312 = vmatpush.bf16.msra.mxu2 %v443_v21 }
  0x26   :  { %148 = vmatpush.bf16.msra.mxu0 %v425_v12 }
  0x27   :  { %231 = vmatpush.bf16.msra.mxu1 %v433_v15  ;;  %313 = vmatpush.bf16.msra.mxu2 %v442_v22 }
  0x2a   :  { %149 = vmatpush.bf16.msra.mxu0 %v424_v13 }
  0x2b   :  { %232 = vmatpush.bf16.msra.mxu1 %v432_v16  ;;  %314 = vmatpush.bf16.msra.mxu2 %v441_v29 }
  0x2d   :  { %150 = vmatmul.bf16.vlgmr.msra.gmra.mxu0 %v73_v14 }
  0x2f   :  { %315 = vmatpush.bf16.msra.mxu2 %v440_v30 }
  0xaa   :  { %v151_v24 = vpop.f32.mrf.mxu0 }
  0xab   :  { %v152_v25 = vadd.f32 %v453_v23, %v151_v24 }
  0xad   :  { %v155_v26 = vmax.f32 %v152_v25, 0.0 }
  0xaf   :  { %v156_v27 = vpack.c.bf16 %v155_v26, %v155_v26 }
  0xb1   :  { %233 = vmatmul.bf16.vlgmr.msra.gmra.mxu1 %v156_v27 }
  0xb2   :  { %v153_v28 = vpop.f32.mrf.mxu0 }
 0x12e   :  { %v234_v32 = vpop.f32.mrf.mxu1 }
 0x12f   :  { %v235_v33 = vadd.f32 %v454_v31, %v234_v32 }
 0x131   :  { %v238_v34 = vmax.f32 %v235_v33, 0.0 }
 0x133   :  { %v239_v35 = vpack.c.bf16 %v238_v34, %v238_v34 }
 0x135   :  { %316 = vmatmul.bf16.vlgmr.msra.gmra.mxu2 %v239_v35 }
 0x136   :  { %v236_v36 = vpop.f32.mrf.mxu1 }
 0x1b8   :  { %v317_v38 = vpop.f32.mrf.mxu2 }
 0x1b9   :  { %v318_v39 = vadd.f32 %v455_v37, %v317_v38 }
 0x1bb   :  { %321 = vst [vmem:[%s608_s7] sm:$0xff] %v318_v39 }
 0x1c0   :  { %v319_v40 = vpop.f32.mrf.mxu2 }
 0x1c1   :  { %326 = vsyncpa [#allocation3], 1 }
 0x1c2   :  { %327 = vsyncpa [#allocation5], 1 }

</bundles_post_ra>
